<compile_context>
chip_gen: v7x
topology: tpu7x:2x2x1
jax: 0.10.0
libtpu: 0.0.40
codegen_flags: <defaults>
</compile_context>

<pallas_src>
import jax
import jax.numpy as jnp
from jax.experimental import pallas as pl
from jax.experimental.pallas import tpu as pltpu

LANE = 128


# ---------------------------------------------------------------------------
# Kernels
# ---------------------------------------------------------------------------

def _linear_kernel(x_ref, wt_ref, b_ref, o_ref):
    """o = x @ Wt + b.  Wt is pre-transposed to (in_features, out_features)."""
    y = jnp.dot(x_ref[...], wt_ref[...], preferred_element_type=jnp.float32)
    o_ref[...] = (y + b_ref[...]).astype(o_ref.dtype)


def _attn_kernel_out_acc(q_ref, k_ref, v_ref, o_ref):
    """score = q @ k^T ; ReLU ; out += alpha @ v.

    Used when the output dtype is f32: accumulate directly into o_ref
    (resident across the kt reduction axis), no scratch needed."""
    kt = pl.program_id(2)

    @pl.when(kt == 0)
    def _():
        o_ref[...] = jnp.zeros_like(o_ref)

    score = jnp.einsum('bqe,bke->bqk', q_ref[...], k_ref[...],
                       preferred_element_type=jnp.float32)
    # TODO(synk): optional `mask` (masked_fill -inf before ReLU) not implemented.
    alpha = jnp.maximum(score, 0.0).astype(v_ref.dtype)   # ReLU; dropout = id
    o_ref[...] += jnp.einsum('bqk,bke->bqe', alpha, v_ref[...],
                             preferred_element_type=jnp.float32)


def _attn_kernel_scratch_acc(q_ref, k_ref, v_ref, o_ref, acc_ref):
    """Same math, but with an f32 VMEM accumulator for non-f32 output dtypes."""
    kt = pl.program_id(2)

    @pl.when(kt == 0)
    def _():
        acc_ref[...] = jnp.zeros_like(acc_ref)

    score = jnp.einsum('bqe,bke->bqk', q_ref[...], k_ref[...],
                       preferred_element_type=jnp.float32)
    alpha = jnp.maximum(score, 0.0).astype(v_ref.dtype)
    acc_ref[...] += jnp.einsum('bqk,bke->bqe', alpha, v_ref[...],
                               preferred_element_type=jnp.float32)

    @pl.when(kt == pl.num_programs(2) - 1)
    def _():
        o_ref[...] = acc_ref[...].astype(o_ref.dtype)


# ---------------------------------------------------------------------------
# Tiling helpers
# ---------------------------------------------------------------------------

def _largest_divisor(n, cap, multiple=1):
    """Largest d <= cap with n % d == 0 and d % multiple == 0; falls back to n."""
    for d in range(min(cap, n), 0, -1):
        if n % d == 0 and d % multiple == 0:
            return d
    return n


def _vmem_capacity_bytes():
    try:
        return int(pltpu.get_tpu_info().vmem_capacity_bytes)
    except Exception:
        return 64 * 1024 * 1024   # v7x-safe fallback


# ---------------------------------------------------------------------------
# Hoisted K/V projection (runs once over B*S rows, not once per query tile)
# ---------------------------------------------------------------------------

def _linear_project(x2d, wt, b_row, out_dtype, vmem_cap, multiple):
    M, Ep = x2d.shape
    io = jnp.dtype(x2d.dtype).itemsize
    wb = jnp.dtype(wt.dtype).itemsize
    ob = jnp.dtype(out_dtype).itemsize
    budget = int(0.75 * vmem_cap)

    def fp(tm):
        return (2 * tm * Ep * io          # input block (double-buffered)
                + 2 * tm * Ep * ob        # output block (double-buffered)
                + 2 * Ep * Ep * wb        # weight block
                + 2 * Ep * 4)             # bias block

    Tm = _largest_divisor(M, 512, multiple=multiple)
    for _ in range(32):
        if fp(Tm) <= budget or Tm <= multiple:
            break
        new = _largest_divisor(M, max(multiple, Tm // 2), multiple=multiple)
        if new >= Tm:
            break
        Tm = new

    vmem_limit = int(min(max(2 * fp(Tm), 32 << 20), int(0.92 * vmem_cap)))
    cost = pl.CostEstimate(
        flops=2 * M * Ep * Ep, transcendentals=0,
        bytes_accessed=M * Ep * (io + ob) + Ep * Ep * wb + Ep * 4)

    return pl.pallas_call(
        _linear_kernel,
        out_shape=jax.ShapeDtypeStruct((M, Ep), out_dtype),
        grid_spec=pltpu.PrefetchScalarGridSpec(
            num_scalar_prefetch=0,
            grid=(M // Tm,),
            in_specs=[pl.BlockSpec((Tm, Ep), lambda i: (i, 0)),
                      pl.BlockSpec((Ep, Ep), lambda i: (0, 0)),
                      pl.BlockSpec((1, Ep), lambda i: (0, 0))],
            out_specs=pl.BlockSpec((Tm, Ep), lambda i: (i, 0))),
        compiler_params=pltpu.CompilerParams(
            dimension_semantics=("parallel",),
            vmem_limit_bytes=vmem_limit),
        cost_estimate=cost,
    )(x2d, wt, b_row)


# ---------------------------------------------------------------------------
# Attention core (score -> ReLU -> output), weights already applied
# ---------------------------------------------------------------------------

def _attention(q, k_lin, v_lin, out_dtype, vmem_cap, multiple,
               batch_tile_cap, seq_tile_cap):
    B, S, Ep = q.shape
    io = jnp.dtype(q.dtype).itemsize
    ob = jnp.dtype(out_dtype).itemsize
    use_scratch = jnp.dtype(out_dtype) != jnp.dtype(jnp.float32)

    def fp(bt, tq, tk):
        f = 2 * bt * tq * Ep * io           # q block (double-buffered)
        f += 2 * 2 * bt * tk * Ep * io      # k_lin, v_lin blocks
        f += 2 * bt * tq * Ep * ob          # output block
        if use_scratch:
            f += bt * tq * Ep * 4           # f32 accumulator scratch
        f += bt * tq * tk * 4               # f32 score tile
        f += bt * tq * tk * io              # ReLU/cast copy of alpha
        return f

    budget = int(0.75 * vmem_cap)
    Bt = _largest_divisor(B, batch_tile_cap)
    Tq = _largest_divisor(S, seq_tile_cap, multiple=multiple)
    Tk = _largest_divisor(S, seq_tile_cap, multiple=multiple)

    # Shrink tiles until the real footprint fits the per-generation budget.
    for _ in range(64):
        if fp(Bt, Tq, Tk) <= budget:
            break
        if Bt > 1:
            new = _largest_divisor(B, max(1, Bt // 2))
            if new < Bt:
                Bt = new
                continue
        if Tk > multiple:
            new = _largest_divisor(S, max(multiple, Tk // 2), multiple=multiple)
            if new < Tk:
                Tk = new
                continue
        if Tq > multiple:
            new = _largest_divisor(S, max(multiple, Tq // 2), multiple=multiple)
            if new < Tq:
                Tq = new
                continue
        break

    # Keep at least 2 parallel grid tiles so both v7x TensorCores get work.
    if (B // Bt) * (S // Tq) < 2:
        if Bt > 1:
            new = _largest_divisor(B, max(1, Bt // 2))
            if new < Bt:
                Bt = new
        if (B // Bt) * (S // Tq) < 2 and Tq > multiple:
            new = _largest_divisor(S, max(multiple, Tq // 2), multiple=multiple)
            if new < Tq:
                Tq = new

    grid = (B // Bt, S // Tq, S // Tk)
    footprint = fp(Bt, Tq, Tk)
    vmem_limit = int(min(max(2 * footprint, 32 << 20), int(0.92 * vmem_cap)))

    q_spec = pl.BlockSpec((Bt, Tq, Ep), lambda b, qi, kt: (b, qi, 0))
    kv_spec = pl.BlockSpec((Bt, Tk, Ep), lambda b, qi, kt: (b, kt, 0))
    o_spec = pl.BlockSpec((Bt, Tq, Ep), lambda b, qi, kt: (b, qi, 0))

    n_qtiles = S // Tq
    cost = pl.CostEstimate(
        flops=4 * B * S * S * Ep, transcendentals=0,
        bytes_accessed=(B * S * Ep * io                    # q read once
                        + 2 * B * S * Ep * io * n_qtiles   # k/v re-streamed
                        + B * S * Ep * ob))                # output written

    kernel = _attn_kernel_scratch_acc if use_scratch else _attn_kernel_out_acc
    scratch = [pltpu.VMEM((Bt, Tq, Ep), jnp.float32)] if use_scratch else []

    return pl.pallas_call(
        kernel,
        out_shape=jax.ShapeDtypeStruct((B, S, Ep), out_dtype),
        grid_spec=pltpu.PrefetchScalarGridSpec(
            num_scalar_prefetch=0,
            grid=grid,
            in_specs=[q_spec, kv_spec, kv_spec],
            out_specs=o_spec,
            scratch_shapes=scratch),
        compiler_params=pltpu.CompilerParams(
            dimension_semantics=("parallel", "parallel", "arbitrary"),
            vmem_limit_bytes=vmem_limit),
        cost_estimate=cost,
    )(q, k_lin, v_lin)


# ---------------------------------------------------------------------------
# Public wrapper
# ---------------------------------------------------------------------------

def pure_correlation(query, key, value, w1, b1, w2, b2, *,
                     bf16_matmul=False, batch_tile_cap=8, seq_tile_cap=256):
    """query/key/value: (B, S, E). w1, w2: (E, E) PyTorch Linear weights
    (out_features, in_features). b1, b2: (E,)."""
    B, S, E = query.shape
    out_dtype = query.dtype

    # Pre-transpose weights once to (in_features, out_features) so the kernels
    # never transpose an Ep x Ep tile per grid step.
    w1t = jnp.transpose(w1)
    w2t = jnp.transpose(w2)

    # Lane-dense zero padding of the embed dim (identical math: padded weight /
    # bias columns are zero => padded k_lin / v_lin / output columns are zero).
    Ep = -(-E // LANE) * LANE
    if Ep != E:
        pe = Ep - E
        pad3 = ((0, 0), (0, 0), (0, pe))
        query = jnp.pad(query, pad3)
        key = jnp.pad(key, pad3)
        value = jnp.pad(value, pad3)
        w1t = jnp.pad(w1t, ((0, pe), (0, pe)))
        w2t = jnp.pad(w2t, ((0, pe), (0, pe)))
        b1 = jnp.pad(b1, (0, pe))
        b2 = jnp.pad(b2, (0, pe))

    b1 = b1.reshape(1, Ep).astype(jnp.float32)
    b2 = b2.reshape(1, Ep).astype(jnp.float32)

    compute_dtype = jnp.bfloat16 if bf16_matmul else query.dtype
    if bf16_matmul:   # bf16 MXU operands everywhere, f32 accumulation
        query = query.astype(jnp.bfloat16)
        key = key.astype(jnp.bfloat16)
        value = value.astype(jnp.bfloat16)
        w1t = w1t.astype(jnp.bfloat16)
        w2t = w2t.astype(jnp.bfloat16)

    multiple = 16 if jnp.dtype(compute_dtype) == jnp.dtype(jnp.bfloat16) else 8
    vmem_cap = _vmem_capacity_bytes()

    # Hoisted projections: k_lin = key @ W1^T + b1, v_lin = value @ W2^T + b2,
    # each computed exactly once over all (B*S) rows.
    k_lin = _linear_project(key.reshape(B * S, Ep), w1t, b1,
                            compute_dtype, vmem_cap, multiple).reshape(B, S, Ep)
    v_lin = _linear_project(value.reshape(B * S, Ep), w2t, b2,
                            compute_dtype, vmem_cap, multiple).reshape(B, S, Ep)

    out = _attention(query, k_lin, v_lin, out_dtype, vmem_cap, multiple,
                     batch_tile_cap, seq_tile_cap)

    if Ep != E:
        out = out[:, :, :E]
    return out


def pure_correlation_ref(query, key, value, w1, b1, w2, b2):
    """Pure-JAX reference of the PyTorch forward (mask=None, eval mode)."""
    k_lin = key @ w1.T + b1
    score = jnp.einsum('bqe,bke->bqk', query, k_lin)
    alpha = jnp.maximum(score, 0.0)
    v_lin = value @ w2.T + b2
    return jnp.einsum('bqk,bke->bqe', alpha, v_lin)


if __name__ == "__main__":
    B, S, E = 2, 8, 32
    root = jax.random.PRNGKey(0)
    kq, kk, kv, kw1, kb1, kw2, kb2 = jax.random.split(root, 7)

    query = jax.random.normal(kq, (B, S, E), dtype=jnp.float32)
    key = jax.random.normal(kk, (B, S, E), dtype=jnp.float32)
    value = jax.random.normal(kv, (B, S, E), dtype=jnp.float32)

    # nn.Linear-style uniform(-1/sqrt(E), 1/sqrt(E)) init
    bound = 1.0 / jnp.sqrt(jnp.float32(E))
    w1 = jax.random.uniform(kw1, (E, E), jnp.float32, -bound, bound)
    b1 = jax.random.uniform(kb1, (E,), jnp.float32, -bound, bound)
    w2 = jax.random.uniform(kw2, (E, E), jnp.float32, -bound, bound)
    b2 = jax.random.uniform(kb2, (E,), jnp.float32, -bound, bound)

    ref = pure_correlation_ref(query, key, value, w1, b1, w2, b2)

    # f32 path: strict check against reference.
    out = jax.block_until_ready(
        pure_correlation(query, key, value, w1, b1, w2, b2))
    assert out.shape == (B, S, E)
    assert jnp.allclose(out, ref, atol=1e-4, rtol=1e-4), "f32 mismatch vs reference"

    # bf16 MXU-operand path (both attention matmuls bf16, f32 accumulation).
    out_bf16 = jax.block_until_ready(
        pure_correlation(query, key, value, w1, b1, w2, b2, bf16_matmul=True))
    rel = jnp.sqrt(jnp.sum((out_bf16 - ref) ** 2)) / jnp.sqrt(jnp.sum(ref ** 2))
    assert rel < 5e-2, f"bf16 path relative error too large: {rel}"

    print("KERNEL_OK")
</pallas_src>

<mosaic_0001>
module attributes {stable_mosaic.version = 11 : i64} {
  func.func @_linear_kernel(%arg0: i32, %arg1: memref<16x128xf32, #tpu.memory_space<vmem>>, %arg2: memref<128x128xf32, #tpu.memory_space<vmem>>, %arg3: memref<1x128xf32, #tpu.memory_space<vmem>>, %arg4: memref<16x128xf32, #tpu.memory_space<vmem>>) attributes {dimension_semantics = [#tpu.dimension_semantics<parallel>], iteration_bounds = array<i64: 1>, scalar_prefetch = 0 : i64, scratch_operands = 0 : i64, tpu.core_type = #tpu.core_type<tc>, window_params = [{transform_indices = @transform_0, window_bounds = array<i64: 16, 128>}, {pipeline_mode = #tpu.pipeline_mode<synchronous>, transform_indices = @transform_1, window_bounds = array<i64: 128, 128>}, {pipeline_mode = #tpu.pipeline_mode<synchronous>, transform_indices = @transform_2, window_bounds = array<i64: 1, 128>}, {transform_indices = @transform_3, window_bounds = array<i64: 16, 128>}]} {
    %c0 = arith.constant 0 : index
    %c0_0 = arith.constant 0 : index
    %0 = vector.load %arg1[%c0, %c0_0] : memref<16x128xf32, #tpu.memory_space<vmem>>, vector<16x128xf32>
    %c0_1 = arith.constant 0 : index
    %c0_2 = arith.constant 0 : index
    %1 = vector.load %arg2[%c0_1, %c0_2] : memref<128x128xf32, #tpu.memory_space<vmem>>, vector<128x128xf32>
    %cst = arith.constant dense<0.000000e+00> : vector<16x128xf32>
    %2 = tpu.matmul %0, %1, %cst {dimension_numbers = #tpu.dot_dimension_numbers<[1], [0], [0], [1], [0, 0, 1, 1], [], []>} : vector<16x128xf32>, vector<128x128xf32>, vector<16x128xf32> -> vector<16x128xf32>
    %c0_3 = arith.constant 0 : index
    %c0_4 = arith.constant 0 : index
    %3 = vector.load %arg3[%c0_3, %c0_4] : memref<1x128xf32, #tpu.memory_space<vmem>>, vector<1x128xf32>
    %4 = vector.broadcast %3 : vector<1x128xf32> to vector<16x128xf32>
    %5 = arith.addf %2, %4 : vector<16x128xf32>
    %c0_5 = arith.constant 0 : index
    %c0_6 = arith.constant 0 : index
    %6 = vector.load %arg4[%c0_5, %c0_6] : memref<16x128xf32, #tpu.memory_space<vmem>>, vector<16x128xf32>
    tpu.vector_store %arg4[%c0_5, %c0_6], %5 {strides = array<i32>} : memref<16x128xf32, #tpu.memory_space<vmem>>, vector<16x128xf32>,
    return
  }
  func.func @transform_0(%arg0: i32) -> (i32, i32) {
    %c0_i32 = arith.constant 0 : i32
    %c0_i32_0 = arith.constant 0 : i32
    return %arg0, %c0_i32 : i32, i32
  }
  func.func @transform_1(%arg0: i32) -> (i32, i32) {
    %c0_i32 = arith.constant 0 : i32
    %c0_i32_0 = arith.constant 0 : i32
    %c0_i32_1 = arith.constant 0 : i32
    return %c0_i32, %c0_i32_0 : i32, i32
  }
  func.func @transform_2(%arg0: i32) -> (i32, i32) {
    %c0_i32 = arith.constant 0 : i32
    %c0_i32_0 = arith.constant 0 : i32
    %c0_i32_1 = arith.constant 0 : i32
    return %c0_i32, %c0_i32_0 : i32, i32
  }
  func.func @transform_3(%arg0: i32) -> (i32, i32) {
    %c0_i32 = arith.constant 0 : i32
    %c0_i32_0 = arith.constant 0 : i32
    return %arg0, %c0_i32 : i32, i32
  }
}

</mosaic_0001>

<bundles_post_ra>
// kernel: tpu_custom_call.1
= control target key start
LH: loop header
LB: loop body
LE: loop exit
PB: predicated region body
PF: predicated region fallthrough
CT: control target
= control target key end

     0   :  { %8 = vsyncpa [#allocation3], 0  ;;  %s399_s0 = inlined_call_operand.hbm [shape: f32[16,128], index: 0, kind: input, shape index: {}]   ;;  %s400_s1 = inlined_call_operand.hbm [shape: f32[128,128], index: 1, kind: input, shape index: {}]   ;;  %s401_s2 = inlined_call_operand.vmem [shape: f32[1,128], index: 2, kind: input, shape index: {}]   ;;  %s402_s3 = inlined_call_operand.hbm [shape: f32[16,128], index: 3, kind: output, shape index: {}]  }
   0x1   :  { %9 = vsyncpa [#allocation6], 0 }
   0x2   :  { %10 = vsyncpa [#allocation4], 0  ;;  %s326_s12 = smov [#allocation2]   ;;  %s254_s16 = scalar_lea.hbm %s399_s0, 256 }
   0x3   :  { %s16_s13 = sshll.u32 %s326_s12, 4  ;;  %p255_p0 = scmp.ne.s32.totalorder %s399_s0, %s254_s16  ;;  %s17_s13 = int_to_ptr.vmem [resolvable:$true] %s16_s13 }
   0x4   :  { %p258_p1 = scmp.lt.u32.totalorder %s254_s16, %s399_s0 }
   0x6   :  { %p260_p2 = pnand %p258_p1, %p255_p0 }
   0x8   :  { %263 = shalt.err (!%p260_p2)
}
   0x9   :  { %s264_s21 = scalar_lea.vmem %s17_s13, 256  ;;  %p269_p4 = scmp.lt.s32.totalorder %s17_s13, %s17_s13 }
   0xa   :  { %p265_p3 = scmp.ne.s32.totalorder %s17_s13, %s264_s21  ;;  %p270_p5 = scmp.lt.s32.totalorder %s264_s21, %s264_s21 }
   0xc   :  { %p271_p6 = por %p270_p5, %p269_p4 }
   0xe   :  { %p272_p7 = pnand %p271_p6, %p265_p3 }
  0x10   :  { %275 = shalt.err (!%p272_p7)
}
  0x11   :  { %s327_s22 = smov 128   ;;  %s328_s23 = smov 8  }
  0x12   :  { %22 = dma.hbm_to_vmem [thread:$0]  %s399_s0, 256, %s17_s13, [#allocation3], %s327_s22, %s327_s22, %s328_s23  }
  0x13   :  { %s329_s26 = smov [#allocation5]   ;;  %s276_s30 = scalar_lea.hbm %s400_s1, 2048 }
  0x14   :  { %s28_s27 = sshll.u32 %s329_s26, 4  ;;  %p277_p8 = scmp.ne.s32.totalorder %s400_s1, %s276_s30  ;;  %s29_s27 = int_to_ptr.vmem [resolvable:$true] %s28_s27 }
  0x15   :  { %p280_p9 = scmp.lt.u32.totalorder %s276_s30, %s400_s1 }
  0x17   :  { %p282_p10 = pnand %p280_p9, %p277_p8 }
  0x19   :  { %285 = shalt.err (!%p282_p10)
}
  0x1a   :  { %s286_s8 = scalar_lea.vmem %s29_s27, 2048  ;;  %p291_p12 = scmp.lt.s32.totalorder %s29_s27, %s29_s27 }
  0x1b   :  { %p287_p11 = scmp.ne.s32.totalorder %s29_s27, %s286_s8  ;;  %p292_p13 = scmp.lt.s32.totalorder %s286_s8, %s286_s8 }
  0x1d   :  { %p293_p0 = por %p292_p13, %p291_p12 }
  0x1f   :  { %p294_p1 = pnand %p293_p0, %p287_p11 }
  0x21   :  { %297 = shalt.err (!%p294_p1)
}
  0x22   :  { %34 = dma.hbm_to_vmem [thread:$0]  %s400_s1, 2048, %s29_s27, [#allocation6], %s327_s22, %s327_s22, %s328_s23  }
  0x23   :  { %320 = dma.done.wait [#allocation3], 256  }
  0x24   :  { %321 = vsyncadd [#allocation3], 4294967040 }
  0x25   :  { %322 = dma.done.wait [#allocation6], 2048  }
  0x26   :  { %323 = vsyncadd [#allocation6], 4294965248  ;;  %v45_v0 = vld [vmem:[#allocation5] sm:$0xff]  ;;  %v46_v1 = vld [vmem:[#allocation5 + $0x8] sm:$0xff]  ;;  %s330_s11 = smov [#allocation7]  }
  0x27   :  { %v47_v2 = vld [vmem:[#allocation5 + $0x10] sm:$0xff]  ;;  %v217_v3 = vpack.c.bf16 %v46_v1, %v45_v0  ;;  %v48_v4 = vld [vmem:[#allocation5 + $0x18] sm:$0xff]  ;;  %v49_v6 = vld [vmem:[#allocation5 + $0x20] sm:$0xff]  ;;  %s150_s12 = sshll.u32 %s330_s11, 4  ;;  %s151_s12 = int_to_ptr.vmem [resolvable:$true] %s150_s12 }
  0x28   :  { %v221_v5 = vpack.c.bf16 %v48_v4, %v47_v2  ;;  %v50_v7 = vld [vmem:[#allocation5 + $0x28] sm:$0xff]  ;;  %v43_v9 = vld [vmem:[#allocation2] sm:$0xff]  ;;  %v52_v11 = vld [vmem:[#allocation5 + $0x38] sm:$0xff]  ;;  %s298_s13 = scalar_lea.vmem %s151_s12, 256  ;;  %p303_p3 = scmp.lt.s32.totalorder %s151_s12, %s151_s12 }
  0x29   :  { %218 = vmatprep.subr.bf16.mxu0 %v217_v3  ;;  %v225_v8 = vpack.c.bf16 %v50_v7, %v49_v6  ;;  %v51_v10 = vld [vmem:[#allocation5 + $0x30] sm:$0xff]  ;;  %214 = vmatprep.mubr.f32.mxu0 %v43_v9  ;;  %v53_v13 = vld [vmem:[#allocation5 + $0x40] sm:$0xff]  ;;  %v54_v14 = vld [vmem:[#allocation5 + $0x48] sm:$0xff]  ;;  %p299_p2 = scmp.ne.s32.totalorder %s151_s12, %s298_s13  ;;  %p304_p4 = scmp.lt.s32.totalorder %s298_s13, %s298_s13 }
  0x2a   :  { %220 = vmatpush3.bf16.msra.mxu0 %v217_v3  ;;  %v229_v12 = vpack.c.bf16 %v52_v11, %v51_v10  ;;  %v233_v15 = vpack.c.bf16 %v54_v14, %v53_v13  ;;  %v55_v16 = vld [vmem:[#allocation5 + $0x50] sm:$0xff]  ;;  %v56_v17 = vld [vmem:[#allocation5 + $0x58] sm:$0xff]  ;;  %v57_v19 = vld [vmem:[#allocation5 + $0x60] sm:$0xff] }
  0x2b   :  { %222 = vmatprep.subr.bf16.mxu0 %v221_v5  ;;  %v237_v18 = vpack.c.bf16 %v56_v17, %v55_v16  ;;  %v58_v20 = vld [vmem:[#allocation5 + $0x68] sm:$0xff]  ;;  %v59_v22 = vld [vmem:[#allocation5 + $0x70] sm:$0xff]  ;;  %v60_v23 = vld [vmem:[#allocation5 + $0x78] sm:$0xff]  ;;  %p305_p5 = por %p304_p4, %p303_p3 }
  0x2c   :  { %v241_v21 = vpack.c.bf16 %v58_v20, %v57_v19  ;;  %v245_v24 = vpack.c.bf16 %v60_v23, %v59_v22  ;;  %v44_v25 = vld [vmem:[#allocation2 + $0x8] sm:$0xff]  ;;  %v163_v26 = vld [vmem:[%s401_s2] ss:$0 sm:$0xff] }
  0x2d   :  { %p306_p6 = pnand %p305_p5, %p299_p2 }
  0x2e   :  { %224 = vmatpush3.bf16.msra.mxu0 %v221_v5 }
  0x2f   :  { %226 = vmatprep.subr.bf16.mxu0 %v225_v8 }
  0x32   :  { %228 = vmatpush3.bf16.msra.mxu0 %v225_v8 }
  0x33   :  { %230 = vmatprep.subr.bf16.mxu0 %v229_v12 }
  0x36   :  { %232 = vmatpush3.bf16.msra.mxu0 %v229_v12 }
  0x37   :  { %234 = vmatprep.subr.bf16.mxu0 %v233_v15 }
  0x3a   :  { %236 = vmatpush3.bf16.msra.mxu0 %v233_v15 }
  0x3b   :  { %238 = vmatprep.subr.bf16.mxu0 %v237_v18 }
  0x3e   :  { %240 = vmatpush3.bf16.msra.mxu0 %v237_v18 }
  0x3f   :  { %242 = vmatprep.subr.bf16.mxu0 %v241_v21 }
  0x42   :  { %244 = vmatpush3.bf16.msra.mxu0 %v241_v21 }
  0x43   :  { %246 = vmatprep.subr.bf16.mxu0 %v245_v24 }
  0x46   :  { %248 = vmatpush3.bf16.msra.mxu0 %v245_v24 }
  0x49   :  { %215 = vmatmul.mubr.f32.vlgmr.msra.gmra.mrb[0].mxu0 %v44_v25 }
 0x11c   :  { %v216_v27 = vpop.f32.mrb[0].mxu0 }
 0x11d   :  { %v140_v28 = vadd.f32 %v216_v27, %v163_v26  ;;  %v134_v29 = vpop.f32.mrb[1].mxu0 }
 0x11e   :  { %v135_v30 = vadd.f32 %v163_v26, %v134_v29 }
 0x11f   :  { %144 = vst [vmem:[#allocation7 + $0x8] sm:$0xff] %v140_v28 }
 0x120   :  { %143 = vst [vmem:[#allocation7] sm:$0xff] %v135_v30 }
 0x121   :  { %309 = shalt.err (!%p306_p6)
}
 0x122   :  { %s310_s2 = scalar_lea.hbm %s402_s3, 256 }
 0x123   :  { %p311_p7 = scmp.ne.s32.totalorder %s402_s3, %s310_s2  ;;  %p314_p8 = scmp.lt.u32.totalorder %s310_s2, %s402_s3 }
 0x125   :  { %p316_p9 = pnand %p314_p8, %p311_p7 }
 0x127   :  { %319 = shalt.err (!%p316_p9)
}
 0x128   :  { %156 = dma.vmem_to_hbm [thread:$0]  %s151_s12, 256, %s402_s3, [#allocation4], %s327_s22, %s327_s22, %s328_s23  }
 0x129   :  { %324 = dma.done.wait [#allocation4], 256  }
 0x12a   :  { %325 = vsyncadd [#allocation4], 4294967040 }
 0x12b   :  { %160 = vsyncpa [#allocation3], 1 }
 0x12c   :  { %161 = vsyncpa [#allocation6], 1 }
 0x12d   :  { %162 = vsyncpa [#allocation4], 1 }

</bundles_post_ra>
